<compile_context>
chip_gen: v7x
topology: tpu7x:2x2x1
jax: 0.10.0
libtpu: 0.0.40
codegen_flags: <defaults>
</compile_context>

<pallas_src>
import functools

import jax
import jax.numpy as jnp
from jax.experimental import pallas as pl
from jax.experimental.pallas import tpu as pltpu


_INV_SQRT2 = 0.7071067811865476


def _round_up(a, b):
    return (a + b - 1) // b * b


def _vmem_limit_bytes():
    """~3/4 of physical VMEM: ~48 MiB on v7x, ~96 MiB on v5e/v6e."""
    try:
        cap = pltpu.get_tpu_info().vmem_capacity_bytes
        return int(cap) * 3 // 4
    except Exception:
        return 48 * 1024 * 1024   # safe on every generation


def _mlp_kernel(x_ref, w1_ref, b1_ref, w2_ref, b2_ref, o_ref, acc_ref,
                *, approximate_gelu: bool):
    h_idx = pl.program_id(1)

    @pl.when(h_idx == 0)
    def _init():
        acc_ref[...] = jnp.zeros_like(acc_ref)

    # Activations cast to the weight (compute) dtype for the MXU; accumulate f32.
    x = x_ref[...].astype(w1_ref.dtype)
    h = jnp.dot(x, w1_ref[...], preferred_element_type=jnp.float32)
    h = h + b1_ref[...].astype(jnp.float32)          # (1, TH) broadcasts over rows

    if approximate_gelu:
        # tanh form lowers to the EUP transcendental slot (free while MXU runs).
        h = jax.nn.gelu(h, approximate=True)
    else:
        # Exact erf GELU (bit-matches PyTorch nn.GELU() default).
        h = 0.5 * h * (1.0 + jax.lax.erf(h * jnp.float32(_INV_SQRT2)))

    acc_ref[...] += jnp.dot(h.astype(w2_ref.dtype), w2_ref[...],
                            preferred_element_type=jnp.float32)

    @pl.when(h_idx == pl.num_programs(1) - 1)
    def _finalize():
        o_ref[...] = (acc_ref[...] + b2_ref[...].astype(jnp.float32)).astype(o_ref.dtype)


def _build_in_specs(TM, C, TH, Co, n_h, single_buffer_stationary):
    def mode(is_stationary):
        if single_buffer_stationary and is_stationary:
            return dict(pipeline_mode=pl.Buffered(buffer_count=1))
        return {}

    # Weights/b1 are only stationary when H fits a single chunk; b2 always is.
    w_stat = (n_h == 1)
    return [
        pl.BlockSpec((TM, C), lambda i, h: (i, 0)),                         # x rows
        pl.BlockSpec((C, TH), lambda i, h: (0, h), **mode(w_stat)),         # w1 chunk
        pl.BlockSpec((1, TH), lambda i, h: (0, h), **mode(w_stat)),         # b1 chunk
        pl.BlockSpec((TH, Co), lambda i, h: (h, 0), **mode(w_stat)),        # w2 chunk
        pl.BlockSpec((1, Co), lambda i, h: (0, 0), **mode(True)),           # b2
    ]


def mlp_pallas(x, w1, b1, w2, b2, *,
               block_rows: int = 512,
               hidden_block: int = 1024,
               compute_dtype=jnp.bfloat16,
               approximate_gelu: bool = True,
               out_dtype=None):
    """y = GELU(x @ w1 + b1) @ w2 + b2, applied over the last axis of x.

    x:  (..., C) float32
    w1: (C, H)   (ideally already in `compute_dtype`)   b1: (1, H)
    w2: (H, Co)  (ideally already in `compute_dtype`)   b2: (1, Co)
    out_dtype: defaults to x.dtype; pass jnp.bfloat16 if the consumer accepts
    bf16 to halve the output writeback.
    """
    *lead, C = x.shape
    H = w1.shape[1]
    Co = w2.shape[1]
    out_dtype = x.dtype if out_dtype is None else out_dtype

    # Weights should be stored in compute_dtype (cast once at init); this cast
    # is only a fallback — it is an extra, un-hidden HBM round trip per call.
    if w1.dtype != compute_dtype:
        w1 = w1.astype(compute_dtype)
    if w2.dtype != compute_dtype:
        w2 = w2.astype(compute_dtype)

    x2 = x.reshape(-1, C)
    M = x2.shape[0]

    # ---- Row tiling: >=2 grid steps (v7x has 2 TCs), minimal padding, and
    # TM >= 256 for large M so each vmatmul fills the 256x256 MXU tile. ----
    m8 = _round_up(max(M, 1), 8)
    grid_m = max(1, pl.cdiv(m8, block_rows))
    if grid_m == 1 and m8 >= 16:
        grid_m = 2
    TM = _round_up(pl.cdiv(m8, grid_m), 8)
    M_pad = TM * grid_m
    if M_pad != M:
        x2 = jnp.pad(x2, ((0, M_pad - M), (0, 0)))

    # ---- Hidden-dim chunking: bounds the (TM, TH) GELU slab and streams the
    # weights through VMEM instead of holding (C,H)+(H,Co) fully resident. ----
    if H <= hidden_block:
        TH, H_pad = H, H
    else:
        TH = hidden_block
        H_pad = _round_up(H, TH)
        if H_pad != H:
            # Rare (H not a multiple of hidden_block).  Zero padding is exact:
            # GELU(0) == 0 and the padded w2 rows are zero.
            w1 = jnp.pad(w1, ((0, 0), (0, H_pad - H)))
            b1 = jnp.pad(b1, ((0, 0), (0, H_pad - H)))
            w2 = jnp.pad(w2, ((0, H_pad - H), (0, 0)))
    n_h = H_pad // TH

    kernel = functools.partial(_mlp_kernel, approximate_gelu=approximate_gelu)

    def call(single_buffer_stationary):
        return pl.pallas_call(
            kernel,
            out_shape=jax.ShapeDtypeStruct((M_pad, Co), out_dtype),
            grid=(grid_m, n_h),
            in_specs=_build_in_specs(TM, C, TH, Co, n_h, single_buffer_stationary),
            out_specs=pl.BlockSpec((TM, Co), lambda i, h: (i, 0)),
            scratch_shapes=[pltpu.VMEM((TM, Co), jnp.float32)],
            compiler_params=pltpu.CompilerParams(
                dimension_semantics=("parallel", "arbitrary"),
                vmem_limit_bytes=_vmem_limit_bytes(),
            ),
        )(x2, w1, b1, w2, b2)

    try:
        out = call(True)
    except Exception:
        # pl.Buffered(1) pipeline hint unsupported on this JAX build -> retry
        # with default (double) buffering.
        out = call(False)

    if M_pad != M:
        out = out[:M]
    return out.reshape(*lead, Co)


def _mlp_reference(x, w1, b1, w2, b2):
    w1 = w1.astype(jnp.float32)
    w2 = w2.astype(jnp.float32)
    h = jnp.dot(x, w1) + b1[0]
    h = 0.5 * h * (1.0 + jax.lax.erf(h * jnp.float32(_INV_SQRT2)))
    return jnp.dot(h, w2) + b2[0]


def init_params(key, in_features, hidden_features=None, out_features=None,
                weight_dtype=jnp.bfloat16):
    hidden = int(hidden_features if hidden_features is not None else in_features * 4)
    out = int(out_features if out_features is not None else in_features)
    ks = jax.random.split(key, 4)
    s = 0.02
    return {
        # Weights stored in the compute dtype ONCE (no per-call cast traffic).
        "w1": (jax.random.normal(ks[0], (in_features, hidden), jnp.float32) * s).astype(weight_dtype),
        "b1": jax.random.normal(ks[1], (1, hidden), jnp.float32) * s,
        "w2": (jax.random.normal(ks[2], (hidden, out), jnp.float32) * s).astype(weight_dtype),
        "b2": jax.random.normal(ks[3], (1, out), jnp.float32) * s,
    }


if __name__ == "__main__":
    # Small ViT-token-style shapes: batch=2, seq=8, channels=32 -> hidden=128.
    B, N, C = 2, 8, 32
    key = jax.random.PRNGKey(0)
    kx, kp = jax.random.split(key)
    x = jax.random.normal(kx, (B, N, C), jnp.float32)
    p = init_params(kp, C)   # hidden = 4 * C = 128 (lane-dense)

    out = mlp_pallas(x, p["w1"], p["b1"], p["w2"], p["b2"])
    out = jax.block_until_ready(out)

    assert out.shape == (B, N, C) and out.dtype == jnp.float32
    ref = _mlp_reference(x, p["w1"], p["b1"], p["w2"], p["b2"])
    err = jnp.max(jnp.abs(out - ref))
    assert float(err) < 1e-2, f"max abs error too large: {float(err)}"

    print("KERNEL_OK")
</pallas_src>

<mosaic_0001>
module attributes {stable_mosaic.version = 11 : i64} {
  func.func @_mlp_kernel(%arg0: i32, %arg1: i32, %arg2: memref<8x32xf32, #tpu.memory_space<vmem>>, %arg3: memref<32x128xbf16, #tpu.memory_space<vmem>>, %arg4: memref<1x128xf32, #tpu.memory_space<vmem>>, %arg5: memref<128x32xbf16, #tpu.memory_space<vmem>>, %arg6: memref<1x32xf32, #tpu.memory_space<vmem>>, %arg7: memref<8x32xf32, #tpu.memory_space<vmem>>, %arg8: memref<8x32xf32, #tpu.memory_space<vmem>>) attributes {dimension_semantics = [#tpu.dimension_semantics<parallel>, #tpu.dimension_semantics<arbitrary>], iteration_bounds = array<i64: 2, 1>, scalar_prefetch = 0 : i64, scratch_operands = 1 : i64, tpu.core_type = #tpu.core_type<tc>, window_params = [{transform_indices = @transform_0, window_bounds = array<i64: 8, 32>}, {pipeline_mode = #tpu.pipeline_mode<synchronous>, transform_indices = @transform_1, window_bounds = array<i64: 32, 128>}, {pipeline_mode = #tpu.pipeline_mode<synchronous>, transform_indices = @transform_2, window_bounds = array<i64: 1, 128>}, {pipeline_mode = #tpu.pipeline_mode<synchronous>, transform_indices = @transform_3, window_bounds = array<i64: 128, 32>}, {pipeline_mode = #tpu.pipeline_mode<synchronous>, transform_indices = @transform_4, window_bounds = array<i64: 1, 32>}, {transform_indices = @transform_5, window_bounds = array<i64: 8, 32>}]} {
    %c0_i32 = arith.constant 0 : i32
    %0 = arith.cmpi eq, %arg1, %c0_i32 : i32
    %1 = arith.extui %0 : i1 to i32
    %c0_i32_0 = arith.constant 0 : i32
    %2 = arith.cmpi ne, %1, %c0_i32_0 : i32
    scf.if %2 {
      %cst_19 = arith.constant 0.000000e+00 : f32
      %32 = vector.broadcast %cst_19 : f32 to vector<8x32xf32>
      %c0_20 = arith.constant 0 : index
      %c0_21 = arith.constant 0 : index
      %33 = vector.load %arg8[%c0_20, %c0_21] : memref<8x32xf32, #tpu.memory_space<vmem>>, vector<8x32xf32>
      tpu.vector_store %arg8[%c0_20, %c0_21], %32 {strides = array<i32>} : memref<8x32xf32, #tpu.memory_space<vmem>>, vector<8x32xf32>,
    } else {
    }
    %c0 = arith.constant 0 : index
    %c0_1 = arith.constant 0 : index
    %3 = vector.load %arg2[%c0, %c0_1] : memref<8x32xf32, #tpu.memory_space<vmem>>, vector<8x32xf32>
    %4 = arith.truncf %3 : vector<8x32xf32> to vector<8x32xbf16>
    %c0_2 = arith.constant 0 : index
    %c0_3 = arith.constant 0 : index
    %5 = vector.load %arg3[%c0_2, %c0_3] : memref<32x128xbf16, #tpu.memory_space<vmem>>, vector<32x128xbf16>
    %cst = arith.constant dense<0.000000e+00> : vector<8x128xf32>
    %6 = tpu.matmul %4, %5, %cst {dimension_numbers = #tpu.dot_dimension_numbers<[1], [0], [0], [1], [0, 0, 1, 1], [], []>} : vector<8x32xbf16>, vector<32x128xbf16>, vector<8x128xf32> -> vector<8x128xf32>
    %c0_4 = arith.constant 0 : index
    %c0_5 = arith.constant 0 : index
    %7 = vector.load %arg4[%c0_4, %c0_5] : memref<1x128xf32, #tpu.memory_space<vmem>>, vector<1x128xf32>
    %8 = vector.broadcast %7 : vector<1x128xf32> to vector<8x128xf32>
    %9 = arith.addf %6, %8 : vector<8x128xf32>
    %10 = arith.mulf %9, %9 : vector<8x128xf32>
    %11 = arith.mulf %9, %10 : vector<8x128xf32>
    %cst_6 = arith.constant 4.471500e-02 : f32
    %12 = vector.broadcast %cst_6 : f32 to vector<8x128xf32>
    %13 = arith.mulf %12, %11 : vector<8x128xf32>
    %14 = arith.addf %9, %13 : vector<8x128xf32>
    %cst_7 = arith.constant 0.797884583 : f32
    %15 = vector.broadcast %cst_7 : f32 to vector<8x128xf32>
    %16 = arith.mulf %15, %14 : vector<8x128xf32>
    %17 = math.tanh %16 : vector<8x128xf32>
    %cst_8 = arith.constant 1.000000e+00 : f32
    %18 = vector.broadcast %cst_8 : f32 to vector<8x128xf32>
    %19 = arith.addf %18, %17 : vector<8x128xf32>
    %cst_9 = arith.constant 5.000000e-01 : f32
    %20 = vector.broadcast %cst_9 : f32 to vector<8x128xf32>
    %21 = arith.mulf %20, %19 : vector<8x128xf32>
    %22 = arith.mulf %9, %21 : vector<8x128xf32>
    %c0_10 = arith.constant 0 : index
    %c0_11 = arith.constant 0 : index
    %23 = vector.load %arg8[%c0_10, %c0_11] : memref<8x32xf32, #tpu.memory_space<vmem>>, vector<8x32xf32>
    %24 = arith.truncf %22 : vector<8x128xf32> to vector<8x128xbf16>
    %c0_12 = arith.constant 0 : index
    %c0_13 = arith.constant 0 : index
    %25 = vector.load %arg5[%c0_12, %c0_13] : memref<128x32xbf16, #tpu.memory_space<vmem>>, vector<128x32xbf16>
    %cst_14 = arith.constant dense<0.000000e+00> : vector<8x32xf32>
    %26 = tpu.matmul %24, %25, %cst_14 {dimension_numbers = #tpu.dot_dimension_numbers<[1], [0], [0], [1], [0, 0, 1, 1], [], []>} : vector<8x128xbf16>, vector<128x32xbf16>, vector<8x32xf32> -> vector<8x32xf32>
    %27 = arith.addf %23, %26 : vector<8x32xf32>
    %c0_15 = arith.constant 0 : index
    %c0_16 = arith.constant 0 : index
    %28 = vector.load %arg8[%c0_15, %c0_16] : memref<8x32xf32, #tpu.memory_space<vmem>>, vector<8x32xf32>
    tpu.vector_store %arg8[%c0_15, %c0_16], %27 {strides = array<i32>} : memref<8x32xf32, #tpu.memory_space<vmem>>, vector<8x32xf32>,
    %c0_i32_17 = arith.constant 0 : i32
    %29 = arith.cmpi eq, %arg1, %c0_i32_17 : i32
    %30 = arith.extui %29 : i1 to i32
    %c0_i32_18 = arith.constant 0 : i32
    %31 = arith.cmpi ne, %30, %c0_i32_18 : i32
    scf.if %31 {
      %c0_19 = arith.constant 0 : index
      %c0_20 = arith.constant 0 : index
      %32 = vector.load %arg8[%c0_19, %c0_20] : memref<8x32xf32, #tpu.memory_space<vmem>>, vector<8x32xf32>
      %c0_21 = arith.constant 0 : index
      %c0_22 = arith.constant 0 : index
      %33 = vector.load %arg6[%c0_21, %c0_22] : memref<1x32xf32, #tpu.memory_space<vmem>>, vector<1x32xf32>
      %34 = vector.broadcast %33 : vector<1x32xf32> to vector<8x32xf32>
      %35 = arith.addf %32, %34 : vector<8x32xf32>
      %c0_23 = arith.constant 0 : index
      %c0_24 = arith.constant 0 : index
      %36 = vector.load %arg7[%c0_23, %c0_24] : memref<8x32xf32, #tpu.memory_space<vmem>>, vector<8x32xf32>
      tpu.vector_store %arg7[%c0_23, %c0_24], %35 {strides = array<i32>} : memref<8x32xf32, #tpu.memory_space<vmem>>, vector<8x32xf32>,
    } else {
    }
    return
  }
  func.func @transform_0(%arg0: i32, %arg1: i32) -> (i32, i32) {
    %c0_i32 = arith.constant 0 : i32
    %c0_i32_0 = arith.constant 0 : i32
    return %arg0, %c0_i32 : i32, i32
  }
  func.func @transform_1(%arg0: i32, %arg1: i32) -> (i32, i32) {
    %c0_i32 = arith.constant 0 : i32
    %c0_i32_0 = arith.constant 0 : i32
    return %c0_i32, %arg1 : i32, i32
  }
  func.func @transform_2(%arg0: i32, %arg1: i32) -> (i32, i32) {
    %c0_i32 = arith.constant 0 : i32
    %c0_i32_0 = arith.constant 0 : i32
    return %c0_i32, %arg1 : i32, i32
  }
  func.func @transform_3(%arg0: i32, %arg1: i32) -> (i32, i32) {
    %c0_i32 = arith.constant 0 : i32
    %c0_i32_0 = arith.constant 0 : i32
    return %arg1, %c0_i32 : i32, i32
  }
  func.func @transform_4(%arg0: i32, %arg1: i32) -> (i32, i32) {
    %c0_i32 = arith.constant 0 : i32
    %c0_i32_0 = arith.constant 0 : i32
    %c0_i32_1 = arith.constant 0 : i32
    return %c0_i32, %c0_i32_0 : i32, i32
  }
  func.func @transform_5(%arg0: i32, %arg1: i32) -> (i32, i32) {
    %c0_i32 = arith.constant 0 : i32
    %c0_i32_0 = arith.constant 0 : i32
    return %arg0, %c0_i32 : i32, i32
  }
}

module attributes {stable_mosaic.version = 11 : i64} {
  func.func @_mlp_kernel(%arg0: i32, %arg1: i32, %arg2: memref<8x32xf32, #tpu.memory_space<vmem>>, %arg3: memref<32x128xbf16, #tpu.memory_space<vmem>>, %arg4: memref<1x128xf32, #tpu.memory_space<vmem>>, %arg5: memref<128x32xbf16, #tpu.memory_space<vmem>>, %arg6: memref<1x32xf32, #tpu.memory_space<vmem>>, %arg7: memref<8x32xf32, #tpu.memory_space<vmem>>, %arg8: memref<8x32xf32, #tpu.memory_space<vmem>>) attributes {dimension_semantics = [#tpu.dimension_semantics<parallel>, #tpu.dimension_semantics<arbitrary>], iteration_bounds = array<i64: 2, 1>, scalar_prefetch = 0 : i64, scratch_operands = 1 : i64, tpu.core_type = #tpu.core_type<tc>, window_params = [{transform_indices = @transform_0, window_bounds = array<i64: 8, 32>}, {transform_indices = @transform_1, window_bounds = array<i64: 32, 128>}, {transform_indices = @transform_2, window_bounds = array<i64: 1, 128>}, {transform_indices = @transform_3, window_bounds = array<i64: 128, 32>}, {pipeline_mode = #tpu.pipeline_mode<synchronous>, transform_indices = @transform_4, window_bounds = array<i64: 1, 32>}, {transform_indices = @transform_5, window_bounds = array<i64: 8, 32>}]} {
    %c0_i32 = arith.constant 0 : i32
    %0 = arith.cmpi eq, %arg1, %c0_i32 : i32
    %1 = arith.extui %0 : i1 to i32
    %c0_i32_0 = arith.constant 0 : i32
    %2 = arith.cmpi ne, %1, %c0_i32_0 : i32
    scf.if %2 {
      %cst_19 = arith.constant 0.000000e+00 : f32
      %32 = vector.broadcast %cst_19 : f32 to vector<8x32xf32>
      %c0_20 = arith.constant 0 : index
      %c0_21 = arith.constant 0 : index
      %33 = vector.load %arg8[%c0_20, %c0_21] : memref<8x32xf32, #tpu.memory_space<vmem>>, vector<8x32xf32>
      tpu.vector_store %arg8[%c0_20, %c0_21], %32 {strides = array<i32>} : memref<8x32xf32, #tpu.memory_space<vmem>>, vector<8x32xf32>,
    } else {
    }
    %c0 = arith.constant 0 : index
    %c0_1 = arith.constant 0 : index
    %3 = vector.load %arg2[%c0, %c0_1] : memref<8x32xf32, #tpu.memory_space<vmem>>, vector<8x32xf32>
    %4 = arith.truncf %3 : vector<8x32xf32> to vector<8x32xbf16>
    %c0_2 = arith.constant 0 : index
    %c0_3 = arith.constant 0 : index
    %5 = vector.load %arg3[%c0_2, %c0_3] : memref<32x128xbf16, #tpu.memory_space<vmem>>, vector<32x128xbf16>
    %cst = arith.constant dense<0.000000e+00> : vector<8x128xf32>
    %6 = tpu.matmul %4, %5, %cst {dimension_numbers = #tpu.dot_dimension_numbers<[1], [0], [0], [1], [0, 0, 1, 1], [], []>} : vector<8x32xbf16>, vector<32x128xbf16>, vector<8x128xf32> -> vector<8x128xf32>
    %c0_4 = arith.constant 0 : index
    %c0_5 = arith.constant 0 : index
    %7 = vector.load %arg4[%c0_4, %c0_5] : memref<1x128xf32, #tpu.memory_space<vmem>>, vector<1x128xf32>
    %8 = vector.broadcast %7 : vector<1x128xf32> to vector<8x128xf32>
    %9 = arith.addf %6, %8 : vector<8x128xf32>
    %10 = arith.mulf %9, %9 : vector<8x128xf32>
    %11 = arith.mulf %9, %10 : vector<8x128xf32>
    %cst_6 = arith.constant 4.471500e-02 : f32
    %12 = vector.broadcast %cst_6 : f32 to vector<8x128xf32>
    %13 = arith.mulf %12, %11 : vector<8x128xf32>
    %14 = arith.addf %9, %13 : vector<8x128xf32>
    %cst_7 = arith.constant 0.797884583 : f32
    %15 = vector.broadcast %cst_7 : f32 to vector<8x128xf32>
    %16 = arith.mulf %15, %14 : vector<8x128xf32>
    %17 = math.tanh %16 : vector<8x128xf32>
    %cst_8 = arith.constant 1.000000e+00 : f32
    %18 = vector.broadcast %cst_8 : f32 to vector<8x128xf32>
    %19 = arith.addf %18, %17 : vector<8x128xf32>
    %cst_9 = arith.constant 5.000000e-01 : f32
    %20 = vector.broadcast %cst_9 : f32 to vector<8x128xf32>
    %21 = arith.mulf %20, %19 : vector<8x128xf32>
    %22 = arith.mulf %9, %21 : vector<8x128xf32>
    %c0_10 = arith.constant 0 : index
    %c0_11 = arith.constant 0 : index
    %23 = vector.load %arg8[%c0_10, %c0_11] : memref<8x32xf32, #tpu.memory_space<vmem>>, vector<8x32xf32>
    %24 = arith.truncf %22 : vector<8x128xf32> to vector<8x128xbf16>
    %c0_12 = arith.constant 0 : index
    %c0_13 = arith.constant 0 : index
    %25 = vector.load %arg5[%c0_12, %c0_13] : memref<128x32xbf16, #tpu.memory_space<vmem>>, vector<128x32xbf16>
    %cst_14 = arith.constant dense<0.000000e+00> : vector<8x32xf32>
    %26 = tpu.matmul %24, %25, %cst_14 {dimension_numbers = #tpu.dot_dimension_numbers<[1], [0], [0], [1], [0, 0, 1, 1], [], []>} : vector<8x128xbf16>, vector<128x32xbf16>, vector<8x32xf32> -> vector<8x32xf32>
    %27 = arith.addf %23, %26 : vector<8x32xf32>
    %c0_15 = arith.constant 0 : index
    %c0_16 = arith.constant 0 : index
    %28 = vector.load %arg8[%c0_15, %c0_16] : memref<8x32xf32, #tpu.memory_space<vmem>>, vector<8x32xf32>
    tpu.vector_store %arg8[%c0_15, %c0_16], %27 {strides = array<i32>} : memref<8x32xf32, #tpu.memory_space<vmem>>, vector<8x32xf32>,
    %c0_i32_17 = arith.constant 0 : i32
    %29 = arith.cmpi eq, %arg1, %c0_i32_17 : i32
    %30 = arith.extui %29 : i1 to i32
    %c0_i32_18 = arith.constant 0 : i32
    %31 = arith.cmpi ne, %30, %c0_i32_18 : i32
    scf.if %31 {
      %c0_19 = arith.constant 0 : index
      %c0_20 = arith.constant 0 : index
      %32 = vector.load %arg8[%c0_19, %c0_20] : memref<8x32xf32, #tpu.memory_space<vmem>>, vector<8x32xf32>
      %c0_21 = arith.constant 0 : index
      %c0_22 = arith.constant 0 : index
      %33 = vector.load %arg6[%c0_21, %c0_22] : memref<1x32xf32, #tpu.memory_space<vmem>>, vector<1x32xf32>
      %34 = vector.broadcast %33 : vector<1x32xf32> to vector<8x32xf32>
      %35 = arith.addf %32, %34 : vector<8x32xf32>
      %c0_23 = arith.constant 0 : index
      %c0_24 = arith.constant 0 : index
      %36 = vector.load %arg7[%c0_23, %c0_24] : memref<8x32xf32, #tpu.memory_space<vmem>>, vector<8x32xf32>
      tpu.vector_store %arg7[%c0_23, %c0_24], %35 {strides = array<i32>} : memref<8x32xf32, #tpu.memory_space<vmem>>, vector<8x32xf32>,
    } else {
    }
    return
  }
  func.func @transform_0(%arg0: i32, %arg1: i32) -> (i32, i32) {
    %c0_i32 = arith.constant 0 : i32
    %c0_i32_0 = arith.constant 0 : i32
    return %arg0, %c0_i32 : i32, i32
  }
  func.func @transform_1(%arg0: i32, %arg1: i32) -> (i32, i32) {
    %c0_i32 = arith.constant 0 : i32
    %c0_i32_0 = arith.constant 0 : i32
    return %c0_i32, %arg1 : i32, i32
  }
  func.func @transform_2(%arg0: i32, %arg1: i32) -> (i32, i32) {
    %c0_i32 = arith.constant 0 : i32
    %c0_i32_0 = arith.constant 0 : i32
    return %c0_i32, %arg1 : i32, i32
  }
  func.func @transform_3(%arg0: i32, %arg1: i32) -> (i32, i32) {
    %c0_i32 = arith.constant 0 : i32
    %c0_i32_0 = arith.constant 0 : i32
    return %arg1, %c0_i32 : i32, i32
  }
  func.func @transform_4(%arg0: i32, %arg1: i32) -> (i32, i32) {
    %c0_i32 = arith.constant 0 : i32
    %c0_i32_0 = arith.constant 0 : i32
    %c0_i32_1 = arith.constant 0 : i32
    return %c0_i32, %c0_i32_0 : i32, i32
  }
  func.func @transform_5(%arg0: i32, %arg1: i32) -> (i32, i32) {
    %c0_i32 = arith.constant 0 : i32
    %c0_i32_0 = arith.constant 0 : i32
    return %arg0, %c0_i32 : i32, i32
  }
}

</mosaic_0001>

<bundles_post_ra>
// kernel: tpu_custom_call.1
= control target key start
LH: loop header
LB: loop body
LE: loop exit
PB: predicated region body
PF: predicated region fallthrough
CT: control target
= control target key end

     0   :  { %10 = vsyncpa [#allocation4], 0  ;;  %s1015_s0 = inlined_call_operand.vmem [shape: f32[16,32], index: 0, kind: input, shape index: {}]   ;;  %s1016_s1 = inlined_call_operand.vmem [shape: bf16[32,128], index: 1, kind: input, shape index: {}]   ;;  %s1017_s2 = inlined_call_operand.vmem [shape: f32[1,128], index: 2, kind: input, shape index: {}]   ;;  %s1018_s3 = inlined_call_operand.vmem [shape: bf16[128,32], index: 3, kind: input, shape index: {}]   ;;  %s1019_s4 = inlined_call_operand.vmem [shape: f32[1,32], index: 4, kind: input, shape index: {}]   ;;  %s1020_s5 = inlined_call_operand.hbm [shape: f32[16,32], index: 5, kind: output, shape index: {}]  }
   0x1   :  { %12 = vsyncpa [#allocation4 + $0x1], 0  ;;  %s863_s18 = smov 0   ;;  %s865_s19 = smov 0  }
   0x2   :  { %s867_s20 = smov 0   ;;  %s869_s21 = smov 0  }
   0x3   :  { %s871_s22 = smov 0   ;;  %s873_s23 = smov 0  }
   0x4 LB: > { %s614_s24 = sadd.s32 4294967295, %s828_s23   ;;  %s615_s25 = sadd.s32 4294967294, %s828_s23   ;;  %s828_s23 = sphi %s873_s23, %s18_s23   ;;  %s824_s22 = sphi %s871_s22, %s1027_s22   ;;  %s820_s21 = sphi %s869_s21, %s1026_s21   ;;  %s816_s20 = sphi %s867_s20, %s1025_s20   ;;  %s812_s19 = sphi %s865_s19, %s1024_s19   ;;  %s808_s18 = sphi %s863_s18, %s1023_s18  }
   0x5   : > { %s30_s26 = sadd.s32 1, %s824_s22  ;;  %s162_s27 = sadd.s32 1, %s816_s20 }
   0x6   : > { %p32_p0 = scmp.ge.s32.totalorder %s30_s26, 2  ;;  %p172_p1 = scmp.ne.s32.totalorder %s816_s20, %s812_s19 }
   0x7   : > { %p173_p2 = scmp.eq.s32.totalorder %s614_s24, 1  ;;  %p178_p3 = scmp.ne.s32.totalorder %s812_s19, %s808_s18 }
   0x8   : > { %s1029_s26 = smov (%p32_p0, %s30_s26), 0  ;;  %p179_p5 = scmp.eq.s32.totalorder %s615_s25, 1 }
   0x9   : > { %p903_p4 = por %p173_p2, %p172_p1  ;;  %s159_s29 = ssub.s32 %s824_s22, %s1029_s26 }
   0xa   : > { %p621_p6 = scmp.ge.s32.totalorder %s828_s23, 1  ;;  %p160_p7 = scmp.eq.s32.totalorder %s159_s29, 0 }
   0xb   : > { %p910_p8 = por %p179_p5, %p178_p3  ;;  %p229_p9 = scmp.lt.s32.totalorder %s828_s23, 3 }
   0xc   : > { %s916_s6 = scalar_select %p160_p7, %s816_s20, %s162_s27  }
   0xd   : > { %p230_p10 = pnand %p621_p6, %p229_p9 }
   0xe   : > { %v738_v0 = vld [vmem:[%s1016_s1] sm:$0xff] (!%p230_p10)   ;;  %v830_v1 = vmov (!%p230_p10), 0.0   ;;  %v739_v2 = vld [vmem:[%s1016_s1 + $0x8] sm:$0xff] (!%p230_p10)   ;;  %vm831_vm0 = vmmov (!%p230_p10), 0   ;;  %p268_p11 = scmp.lt.s32.totalorder (!%p230_p10), %s820_s21, 1  ;;  %vm290_vm1 = vcmask (!%p230_p10), 261120  }
   0xf   : > { %233 = sbr.rel (%p230_p10) target bundleno = 510 (0x1fe), region = 40  ;;  %653 = vmatprep.subr.bf16.mxu0 (!%p230_p10), %v830_v1  ;;  %661 = vmatprep.subr.bf16.mxu1 (!%p230_p10), %v830_v1  ;;  %291 = vst.msk [vmem:[#allocation2] sm:$0xff] (!%p230_p10), %vm290_vm1, %v830_v1  ;;  %v740_v5 = vld [vmem:[%s1018_s3] sm:$0xff] (!%p230_p10)   ;;  %v741_v6 = vld [vmem:[%s1018_s3 + $0x8] sm:$0xff] (!%p230_p10)   ;;  %v742_v7 = vld [vmem:[%s1018_s3 + $0x10] sm:$0xff] (!%p230_p10)   ;;  %s265_s25 = sand.u32 (!%p230_p10), 1, %s812_s19  }
  0x10   : > { %654 = vmatpush3.bf16.msra.mxu0 (!%p230_p10), %v738_v0  ;;  %657 = vmatprep.mubr.msk.bf16.mxu0 (!%p230_p10), %vm831_vm0, %v830_v1  ;;  %v743_v8 = vld [vmem:[%s1018_s3 + $0x18] sm:$0xff] (!%p230_p10)   ;;  %v744_v9 = vld [vmem:[%s1018_s3 + $0x20] sm:$0xff] (!%p230_p10)   ;;  %v745_v10 = vld [vmem:[%s1018_s3 + $0x28] sm:$0xff] (!%p230_p10)   ;;  %s622_s27 = sshll.u32 (!%p230_p10), %s265_s25, 3  ;;  %s638_s8 = sshll.u32 (!%p230_p10), %s820_s21, 7 }
  0x11   : > { %655 = vmatprep.subr.bf16.mxu0 (!%p230_p10), %v830_v1  ;;  %677 = vmatprep.mubr.msk.bf16.mxu1 (!%p230_p10), %vm831_vm0, %v830_v1  ;;  %v746_v11 = vld [vmem:[%s1018_s3 + $0x30] sm:$0xff] (!%p230_p10)   ;;  %v747_v12 = vld [vmem:[%s1018_s3 + $0x38] sm:$0xff] (!%p230_p10)   ;;  %v624_v13 = vld [vmem:[%s1017_s2] ss:$0 sm:$0xff] (!%p230_p10)  ;;  %s267_s9 = scalar_lea.vmem (!%p230_p10), [#allocation3], %s622_s27  ;;  %s967_s13 = scalar_lea.hbm (!%p230_p10), %s1020_s5, %s638_s8 }
  0x12   : > { %662 = vmatpush3.bf16.msra.mxu1 (!%p230_p10), %v740_v5  ;;  %v636_v35 = vld [vmem:[%s1019_s4] ss:$0 sm:$0xff] (!%p230_p10)  ;;  %s505_s10 = sshll.u32 (!%p230_p10), %s267_s9, 4  ;;  %s492_s14 = scalar_lea.sflag (!%p230_p10), [#allocation4], %s265_s25  ;;  %s969_s10 = int_to_ptr.vmem [resolvable:$true] %s505_s10 }
  0x13   : > { %663 = vmatprep.subr.bf16.mxu1 (!%p230_p10), %v830_v1 }
  0x14   : > { %656 = vmatpush3.bf16.msra.mxu0 (!%p230_p10), %v739_v2 }
  0x16   : > { %s269_s11 = scalar_select %p268_p11, %s820_s21, 1  ;;  %664 = vmatpush3.bf16.msra.mxu1 %v741_v6  ;;  %v370_v29 = vld [vmem:[#allocation2] sm:$0xff] }
  0x17   : > { %665 = vmatprep.subr.bf16.mxu1 %v830_v1  ;;  %s832_s21 = smov [#allocation3]  }
  0x18   : > { %s623_s12 = sshll.u32 %s269_s11, 3  ;;  %s754_s16 = sshll.u32 %s832_s21, 4  ;;  %s755_s16 = int_to_ptr.vmem [resolvable:$false] %s754_s16 }
  0x19   : > { %s271_s15 = scalar_lea.vmem %s1015_s0, %s623_s12  ;;  %s756_s17 = scalar_lea.vmem %s755_s16, 256 }
  0x1a   : > { %v292_v3 = vld [vmem:[%s271_s15] sm:$0xff]  ;;  %666 = vmatpush3.bf16.msra.mxu1 %v742_v7  ;;  %s750_s15 = scalar_lea.vmem %s969_s10, 128  ;;  %p757_p1 = scmp.lt.s32.totalorder %s969_s10, %s755_s16 }
  0x1b   : > { %v293_v4 = vpack.c.bf16 %v292_v3, %v292_v3  ;;  %667 = vmatprep.subr.bf16.mxu1 %v830_v1  ;;  %p751_p12 = scmp.ne.s32.totalorder %s969_s10, %s750_s15  ;;  %p758_p2 = scmp.lt.s32.totalorder %s756_s17, %s750_s15 }
  0x1d   : > { %658 = vmatmul.mubr.msk.bf16.vlgmr.msra.gmra.mrb[0].mxu0 %vm290_vm1, %v293_v4  ;;  %p752_p13 = pnand %p751_p12, %p903_p4  ;;  %p759_p3 = por %p758_p2, %p757_p1 }
  0x1e   : > { %668 = vmatpush3.bf16.msra.mxu1 %v743_v8 }
  0x1f   : > { %669 = vmatprep.subr.bf16.mxu1 %v830_v1  ;;  %p753_p0 = pneg %p752_p13 }
  0x21   : > { %p760_p5 = pnand %p759_p3, %p753_p0 }
  0x22   : > { %670 = vmatpush3.bf16.msra.mxu1 %v744_v9 }
  0x23   : > { %671 = vmatprep.subr.bf16.mxu1 %v830_v1 }
  0x26   : > { %672 = vmatpush3.bf16.msra.mxu1 %v745_v10 }
  0x27   : > { %673 = vmatprep.subr.bf16.mxu1 %v830_v1 }
  0x2a   : > { %674 = vmatpush3.bf16.msra.mxu1 %v746_v11 }
  0x2b   : > { %675 = vmatprep.subr.bf16.mxu1 %v830_v1 }
  0x2e   : > { %676 = vmatpush3.bf16.msra.mxu1 %v747_v12 }
  0xf0   : > { %v355_v14 = vpop.f32.mrb[0].mxu0 }
  0xf1   : > { %v356_v15 = vadd.f32 %v624_v13, %v355_v14  ;;  %v659_v16 = vpop.f32.mrb[1].mxu0 }
  0xf2   : > { %v358_v17 = vpop.f32.mrb[2].mxu0 }
  0xf3   : > { %v361_v18 = vmul.f32 %v356_v15, %v356_v15  ;;  %v660_v19 = vpop.f32.mrb[3].mxu0 }
  0xf5   : > { %v362_v20 = vmul.f32 %v361_v18, %v356_v15 }
  0xf7   : > { %v363_v21 = vmul.f32 0.044715, %v362_v20 }
  0xf9   : > { %v364_v22 = vadd.f32 %v363_v21, %v356_v15 }
  0xfb   : > { %v365_v23 = vmul.f32 0.7978846, %v364_v22 }
  0xfd   : > { %748 = vtanh.f32 %v365_v23 }
 0x107   : > { %v749_v24 = vpop.eup %748 }
 0x108   : > { %v367_v25 = vadd.f32 1.0, %v749_v24 }
 0x10a   : > { %v368_v26 = vmul.f32 0.5, %v367_v25 }
 0x10c   : > { %v369_v27 = vmul.f32 %v368_v26, %v356_v15 }
 0x10e   : > { %v371_v28 = vpack.c.bf16 %v369_v27, %v369_v27 }
 0x110   : > { %678 = vmatmul.mubr.bf16.vlgmr.msra.gmra.mrb[0].mxu1 %v371_v28 }
 0x1e3   : > { %v470_v30 = vpop.f32.mrb[0].mxu1 }
 0x1e4   : > { %v476_v31 = vadd.f32 %v470_v30, %v370_v29  ;;  %v679_v32 = vpop.f32.mrb[1].mxu1 }
 0x1e5   : > { %v473_v33 = vpop.f32.mrb[2].mxu1 }
 0x1e6   : > { %477 = vst.msk [vmem:[#allocation2] sm:$0xff] %vm290_vm1, %v476_v31  ;;  %v680_v34 = vpop.f32.mrb[3].mxu1 }
 0x1ed   : > { %v481_v36 = vld [vmem:[#allocation2] sm:$0xff] }
 0x1ee   : > { %v489_v37 = vadd.f32 %v636_v35, %v481_v36 }
 0x1f0   : > { %490 = vst.msk [vmem:[%s267_s9] sm:$0xff] %vm290_vm1, %v489_v37 }
 0x1f1   : > { %763 = shalt.err (!%p760_p5)
}
 0x1f2   : > { %s764_s24 = scalar_lea.hbm %s967_s13, 128  ;;  %s768_s29 = scalar_lea.hbm %s1020_s5, 256 }
 0x1f3   : > { %p765_p6 = scmp.ne.s32.totalorder %s967_s13, %s764_s24  ;;  %p769_p10 = scmp.lt.u32.totalorder %s967_s13, %s1020_s5 }
 0x1f4   : > { %p770_p11 = scmp.lt.u32.totalorder %s768_s29, %s764_s24  ;;  %p772_p13 = scmp.lt.u32.totalorder %s764_s24, %s967_s13 }
 0x1f5   : > { %p766_p7 = pnand %p765_p6, %p903_p4 }
 0x1f6   : > { %p771_p12 = por %p770_p11, %p769_p10 }
 0x1f7   : > { %p767_p9 = pneg %p766_p7 }
 0x1f8   : > { %p773_p0 = por %p772_p13, %p771_p12 }
 0x1fa   : > { %p774_p1 = pnand %p773_p0, %p767_p9 }
 0x1fc   : > { %777 = shalt.err (!%p774_p1)
}
 0x1fd   : > { %681 = dma.vmem_to_hbm [thread:$0]  (%p903_p4), %s969_s10, 128, %s967_s13, %s492_s14  }
 0x1fe PF: > { %p687_p2 = scmp.ge.s32.totalorder %s828_s23, 2  ;;  %s517_s9 = sand.u32 1, %s808_s18  }
 0x1ff   : > { %s518_s11 = scalar_lea.sflag [#allocation4], %s517_s9 }
 0x200   : > { %p684_p3 = pnand %p687_p2, %p910_p8 }
 0x202   : > { %803 = dma.done.wait (!%p684_p3), %s518_s11, 128  }
 0x203   : > { %805 = vsyncadd (!%p684_p3), %s518_s11, 4294967168  ;;  %s18_s23 = sadd.s32 1, %s828_s23   ;;  %s1023_s18 = smov %s812_s19 }
 0x204   : > { %p15_p5 = scmp.ge.s32.totalorder %s18_s23, 4   ;;  %s1024_s19 = smov %s816_s20 }
 0x205   : > { %s1025_s20 = smov %s916_s6  ;;  %s1026_s21 = smov %s824_s22 }
 0x206   : > { %s1027_s22 = smov %s1029_s26  ;;  %17 = sbr.rel (!%p15_p5) target bundleno = 4 (0x4), region = 92 }
 0x20d   :  { %523 = vsyncpa [#allocation4], 1 }
 0x20e   :  { %525 = vsyncpa [#allocation4 + $0x1], 1 }

// kernel: tpu_custom_call.1
= control target key start
LH: loop header
LB: loop body
LE: loop exit
PB: predicated region body
PF: predicated region fallthrough
CT: control target
= control target key end

     0   :  { %10 = vsyncpa [#allocation4], 0  ;;  %s1015_s0 = inlined_call_operand.vmem [shape: f32[16,32], index: 0, kind: input, shape index: {}]   ;;  %s1016_s1 = inlined_call_operand.vmem [shape: bf16[32,128], index: 1, kind: input, shape index: {}]   ;;  %s1017_s2 = inlined_call_operand.vmem [shape: f32[1,128], index: 2, kind: input, shape index: {}]   ;;  %s1018_s3 = inlined_call_operand.vmem [shape: bf16[128,32], index: 3, kind: input, shape index: {}]   ;;  %s1019_s4 = inlined_call_operand.vmem [shape: f32[1,32], index: 4, kind: input, shape index: {}]   ;;  %s1020_s5 = inlined_call_operand.hbm [shape: f32[16,32], index: 5, kind: output, shape index: {}]  }
   0x1   :  { %12 = vsyncpa [#allocation4 + $0x1], 0  ;;  %s863_s18 = smov 0   ;;  %s865_s19 = smov 0  }
   0x2   :  { %s867_s20 = smov 0   ;;  %s869_s21 = smov 0  }
   0x3   :  { %s871_s22 = smov 0   ;;  %s873_s23 = smov 0  }
   0x4 LB: > { %s614_s24 = sadd.s32 4294967295, %s828_s23   ;;  %s615_s25 = sadd.s32 4294967294, %s828_s23   ;;  %s828_s23 = sphi %s873_s23, %s18_s23   ;;  %s824_s22 = sphi %s871_s22, %s1027_s22   ;;  %s820_s21 = sphi %s869_s21, %s1026_s21   ;;  %s816_s20 = sphi %s867_s20, %s1025_s20   ;;  %s812_s19 = sphi %s865_s19, %s1024_s19   ;;  %s808_s18 = sphi %s863_s18, %s1023_s18  }
   0x5   : > { %s30_s26 = sadd.s32 1, %s824_s22  ;;  %s162_s27 = sadd.s32 1, %s816_s20 }
   0x6   : > { %p32_p0 = scmp.ge.s32.totalorder %s30_s26, 2  ;;  %p172_p1 = scmp.ne.s32.totalorder %s816_s20, %s812_s19 }
   0x7   : > { %p173_p2 = scmp.eq.s32.totalorder %s614_s24, 1  ;;  %p178_p3 = scmp.ne.s32.totalorder %s812_s19, %s808_s18 }
   0x8   : > { %s1029_s26 = smov (%p32_p0, %s30_s26), 0  ;;  %p179_p5 = scmp.eq.s32.totalorder %s615_s25, 1 }
   0x9   : > { %p903_p4 = por %p173_p2, %p172_p1  ;;  %s159_s29 = ssub.s32 %s824_s22, %s1029_s26 }
   0xa   : > { %p621_p6 = scmp.ge.s32.totalorder %s828_s23, 1  ;;  %p160_p7 = scmp.eq.s32.totalorder %s159_s29, 0 }
   0xb   : > { %p910_p8 = por %p179_p5, %p178_p3  ;;  %p229_p9 = scmp.lt.s32.totalorder %s828_s23, 3 }
   0xc   : > { %s916_s6 = scalar_select %p160_p7, %s816_s20, %s162_s27  }
   0xd   : > { %p230_p10 = pnand %p621_p6, %p229_p9 }
   0xe   : > { %v738_v0 = vld [vmem:[%s1016_s1] sm:$0xff] (!%p230_p10)   ;;  %v830_v1 = vmov (!%p230_p10), 0.0   ;;  %v739_v2 = vld [vmem:[%s1016_s1 + $0x8] sm:$0xff] (!%p230_p10)   ;;  %vm831_vm0 = vmmov (!%p230_p10), 0   ;;  %p268_p11 = scmp.lt.s32.totalorder (!%p230_p10), %s820_s21, 1  ;;  %vm290_vm1 = vcmask (!%p230_p10), 261120  }
   0xf   : > { %233 = sbr.rel (%p230_p10) target bundleno = 510 (0x1fe), region = 40  ;;  %653 = vmatprep.subr.bf16.mxu0 (!%p230_p10), %v830_v1  ;;  %661 = vmatprep.subr.bf16.mxu1 (!%p230_p10), %v830_v1  ;;  %291 = vst.msk [vmem:[#allocation2] sm:$0xff] (!%p230_p10), %vm290_vm1, %v830_v1  ;;  %v740_v5 = vld [vmem:[%s1018_s3] sm:$0xff] (!%p230_p10)   ;;  %v741_v6 = vld [vmem:[%s1018_s3 + $0x8] sm:$0xff] (!%p230_p10)   ;;  %v742_v7 = vld [vmem:[%s1018_s3 + $0x10] sm:$0xff] (!%p230_p10)   ;;  %s265_s25 = sand.u32 (!%p230_p10), 1, %s812_s19  }
  0x10   : > { %654 = vmatpush3.bf16.msra.mxu0 (!%p230_p10), %v738_v0  ;;  %657 = vmatprep.mubr.msk.bf16.mxu0 (!%p230_p10), %vm831_vm0, %v830_v1  ;;  %v743_v8 = vld [vmem:[%s1018_s3 + $0x18] sm:$0xff] (!%p230_p10)   ;;  %v744_v9 = vld [vmem:[%s1018_s3 + $0x20] sm:$0xff] (!%p230_p10)   ;;  %v745_v10 = vld [vmem:[%s1018_s3 + $0x28] sm:$0xff] (!%p230_p10)   ;;  %s622_s27 = sshll.u32 (!%p230_p10), %s265_s25, 3  ;;  %s638_s8 = sshll.u32 (!%p230_p10), %s820_s21, 7 }
  0x11   : > { %655 = vmatprep.subr.bf16.mxu0 (!%p230_p10), %v830_v1  ;;  %677 = vmatprep.mubr.msk.bf16.mxu1 (!%p230_p10), %vm831_vm0, %v830_v1  ;;  %v746_v11 = vld [vmem:[%s1018_s3 + $0x30] sm:$0xff] (!%p230_p10)   ;;  %v747_v12 = vld [vmem:[%s1018_s3 + $0x38] sm:$0xff] (!%p230_p10)   ;;  %v624_v13 = vld [vmem:[%s1017_s2] ss:$0 sm:$0xff] (!%p230_p10)  ;;  %s267_s9 = scalar_lea.vmem (!%p230_p10), [#allocation3], %s622_s27  ;;  %s967_s13 = scalar_lea.hbm (!%p230_p10), %s1020_s5, %s638_s8 }
  0x12   : > { %662 = vmatpush3.bf16.msra.mxu1 (!%p230_p10), %v740_v5  ;;  %v636_v35 = vld [vmem:[%s1019_s4] ss:$0 sm:$0xff] (!%p230_p10)  ;;  %s505_s10 = sshll.u32 (!%p230_p10), %s267_s9, 4  ;;  %s492_s14 = scalar_lea.sflag (!%p230_p10), [#allocation4], %s265_s25  ;;  %s969_s10 = int_to_ptr.vmem [resolvable:$true] %s505_s10 }
  0x13   : > { %663 = vmatprep.subr.bf16.mxu1 (!%p230_p10), %v830_v1 }
  0x14   : > { %656 = vmatpush3.bf16.msra.mxu0 (!%p230_p10), %v739_v2 }
  0x16   : > { %s269_s11 = scalar_select %p268_p11, %s820_s21, 1  ;;  %664 = vmatpush3.bf16.msra.mxu1 %v741_v6  ;;  %v370_v29 = vld [vmem:[#allocation2] sm:$0xff] }
  0x17   : > { %665 = vmatprep.subr.bf16.mxu1 %v830_v1  ;;  %s832_s21 = smov [#allocation3]  }
  0x18   : > { %s623_s12 = sshll.u32 %s269_s11, 3  ;;  %s754_s16 = sshll.u32 %s832_s21, 4  ;;  %s755_s16 = int_to_ptr.vmem [resolvable:$false] %s754_s16 }
  0x19   : > { %s271_s15 = scalar_lea.vmem %s1015_s0, %s623_s12  ;;  %s756_s17 = scalar_lea.vmem %s755_s16, 256 }
  0x1a   : > { %v292_v3 = vld [vmem:[%s271_s15] sm:$0xff]  ;;  %666 = vmatpush3.bf16.msra.mxu1 %v742_v7  ;;  %s750_s15 = scalar_lea.vmem %s969_s10, 128  ;;  %p757_p1 = scmp.lt.s32.totalorder %s969_s10, %s755_s16 }
  0x1b   : > { %v293_v4 = vpack.c.bf16 %v292_v3, %v292_v3  ;;  %667 = vmatprep.subr.bf16.mxu1 %v830_v1  ;;  %p751_p12 = scmp.ne.s32.totalorder %s969_s10, %s750_s15  ;;  %p758_p2 = scmp.lt.s32.totalorder %s756_s17, %s750_s15 }
  0x1d   : > { %658 = vmatmul.mubr.msk.bf16.vlgmr.msra.gmra.mrb[0].mxu0 %vm290_vm1, %v293_v4  ;;  %p752_p13 = pnand %p751_p12, %p903_p4  ;;  %p759_p3 = por %p758_p2, %p757_p1 }
  0x1e   : > { %668 = vmatpush3.bf16.msra.mxu1 %v743_v8 }
  0x1f   : > { %669 = vmatprep.subr.bf16.mxu1 %v830_v1  ;;  %p753_p0 = pneg %p752_p13 }
  0x21   : > { %p760_p5 = pnand %p759_p3, %p753_p0 }
  0x22   : > { %670 = vmatpush3.bf16.msra.mxu1 %v744_v9 }
  0x23   : > { %671 = vmatprep.subr.bf16.mxu1 %v830_v1 }
  0x26   : > { %672 = vmatpush3.bf16.msra.mxu1 %v745_v10 }
  0x27   : > { %673 = vmatprep.subr.bf16.mxu1 %v830_v1 }
  0x2a   : > { %674 = vmatpush3.bf16.msra.mxu1 %v746_v11 }
  0x2b   : > { %675 = vmatprep.subr.bf16.mxu1 %v830_v1 }
  0x2e   : > { %676 = vmatpush3.bf16.msra.mxu1 %v747_v12 }
  0xf0   : > { %v355_v14 = vpop.f32.mrb[0].mxu0 }
  0xf1   : > { %v356_v15 = vadd.f32 %v624_v13, %v355_v14  ;;  %v659_v16 = vpop.f32.mrb[1].mxu0 }
  0xf2   : > { %v358_v17 = vpop.f32.mrb[2].mxu0 }
  0xf3   : > { %v361_v18 = vmul.f32 %v356_v15, %v356_v15  ;;  %v660_v19 = vpop.f32.mrb[3].mxu0 }
  0xf5   : > { %v362_v20 = vmul.f32 %v361_v18, %v356_v15 }
  0xf7   : > { %v363_v21 = vmul.f32 0.044715, %v362_v20 }
  0xf9   : > { %v364_v22 = vadd.f32 %v363_v21, %v356_v15 }
  0xfb   : > { %v365_v23 = vmul.f32 0.7978846, %v364_v22 }
  0xfd   : > { %748 = vtanh.f32 %v365_v23 }
 0x107   : > { %v749_v24 = vpop.eup %748 }
 0x108   : > { %v367_v25 = vadd.f32 1.0, %v749_v24 }
 0x10a   : > { %v368_v26 = vmul.f32 0.5, %v367_v25 }
 0x10c   : > { %v369_v27 = vmul.f32 %v368_v26, %v356_v15 }
 0x10e   : > { %v371_v28 = vpack.c.bf16 %v369_v27, %v369_v27 }
 0x110   : > { %678 = vmatmul.mubr.bf16.vlgmr.msra.gmra.mrb[0].mxu1 %v371_v28 }
 0x1e3   : > { %v470_v30 = vpop.f32.mrb[0].mxu1 }
 0x1e4   : > { %v476_v31 = vadd.f32 %v470_v30, %v370_v29  ;;  %v679_v32 = vpop.f32.mrb[1].mxu1 }
 0x1e5   : > { %v473_v33 = vpop.f32.mrb[2].mxu1 }
 0x1e6   : > { %477 = vst.msk [vmem:[#allocation2] sm:$0xff] %vm290_vm1, %v476_v31  ;;  %v680_v34 = vpop.f32.mrb[3].mxu1 }
 0x1ed   : > { %v481_v36 = vld [vmem:[#allocation2] sm:$0xff] }
 0x1ee   : > { %v489_v37 = vadd.f32 %v636_v35, %v481_v36 }
 0x1f0   : > { %490 = vst.msk [vmem:[%s267_s9] sm:$0xff] %vm290_vm1, %v489_v37 }
 0x1f1   : > { %763 = shalt.err (!%p760_p5)
}
 0x1f2   : > { %s764_s24 = scalar_lea.hbm %s967_s13, 128  ;;  %s768_s29 = scalar_lea.hbm %s1020_s5, 256 }
 0x1f3   : > { %p765_p6 = scmp.ne.s32.totalorder %s967_s13, %s764_s24  ;;  %p769_p10 = scmp.lt.u32.totalorder %s967_s13, %s1020_s5 }
 0x1f4   : > { %p770_p11 = scmp.lt.u32.totalorder %s768_s29, %s764_s24  ;;  %p772_p13 = scmp.lt.u32.totalorder %s764_s24, %s967_s13 }
 0x1f5   : > { %p766_p7 = pnand %p765_p6, %p903_p4 }
 0x1f6   : > { %p771_p12 = por %p770_p11, %p769_p10 }
 0x1f7   : > { %p767_p9 = pneg %p766_p7 }
 0x1f8   : > { %p773_p0 = por %p772_p13, %p771_p12 }
 0x1fa   : > { %p774_p1 = pnand %p773_p0, %p767_p9 }
 0x1fc   : > { %777 = shalt.err (!%p774_p1)
}
 0x1fd   : > { %681 = dma.vmem_to_hbm [thread:$0]  (%p903_p4), %s969_s10, 128, %s967_s13, %s492_s14  }
 0x1fe PF: > { %p687_p2 = scmp.ge.s32.totalorder %s828_s23, 2  ;;  %s517_s9 = sand.u32 1, %s808_s18  }
 0x1ff   : > { %s518_s11 = scalar_lea.sflag [#allocation4], %s517_s9 }
 0x200   : > { %p684_p3 = pnand %p687_p2, %p910_p8 }
 0x202   : > { %803 = dma.done.wait (!%p684_p3), %s518_s11, 128  }
 0x203   : > { %805 = vsyncadd (!%p684_p3), %s518_s11, 4294967168  ;;  %s18_s23 = sadd.s32 1, %s828_s23   ;;  %s1023_s18 = smov %s812_s19 }
 0x204   : > { %p15_p5 = scmp.ge.s32.totalorder %s18_s23, 4   ;;  %s1024_s19 = smov %s816_s20 }
 0x205   : > { %s1025_s20 = smov %s916_s6  ;;  %s1026_s21 = smov %s824_s22 }
 0x206   : > { %s1027_s22 = smov %s1029_s26  ;;  %17 = sbr.rel (!%p15_p5) target bundleno = 4 (0x4), region = 92 }
 0x20d   :  { %523 = vsyncpa [#allocation4], 1 }
 0x20e   :  { %525 = vsyncpa [#allocation4 + $0x1], 1 }

</bundles_post_ra>
